<compile_context>
chip_gen: v7x
topology: tpu7x:2x2x1
jax: 0.10.0
libtpu: 0.0.40
codegen_flags: <defaults>
</compile_context>

<pallas_src>
import functools

import jax
import jax.numpy as jnp
from jax.experimental import pallas as pl
from jax.experimental.pallas import tpu as pltpu

P_DROP = 0.5
_ROW_STRIDE = 2048  # > 1000 + 1024, keeps the two dropout layers' hash ids disjoint


def _round_up(n, m):
    return ((n + m - 1) // m) * m


def _regressor_sr50_kernel(seed_ref, x_ref, w0_ref, b0_ref, w1_ref, b1_ref,
                           w2_ref, b2_ref, va_ref, btl2_ref, *, training):
    tb = x_ref.shape[0]
    seed = seed_ref[0].astype(jnp.uint32)
    row0 = (pl.program_id(0) * tb).astype(jnp.uint32)

    def dropout(v, col_offset):
        if not training:
            return v
        n_rows, n_cols = v.shape
        rows = jax.lax.broadcasted_iota(jnp.int32, (n_rows, n_cols), 0).astype(jnp.uint32)
        cols = jax.lax.broadcasted_iota(jnp.int32, (n_rows, n_cols), 1).astype(jnp.uint32)
        # Unique 32-bit counter per element of the full (padded) activation, per layer.
        idx = (row0 + rows) * jnp.uint32(_ROW_STRIDE) + (cols + jnp.uint32(col_offset))
        # lowbias32-style integer mixer; the MSB is a fair coin -> p(keep) = 0.5.
        h = idx ^ (seed * jnp.uint32(0x9E3779B9))
        h = h ^ (h >> 16)
        h = h * jnp.uint32(0x7FEB352D)
        h = h ^ (h >> 15)
        h = h * jnp.uint32(0x846CA68B)
        h = h ^ (h >> 16)
        keep = (h >> 31) == 0
        scale = jnp.asarray(1.0 / (1.0 - P_DROP), v.dtype)
        return jnp.where(keep, v * scale, jnp.zeros_like(v))

    # x_btl_1 = relu(lin0(dropout2d(x)))   -- bf16 MXU matmul, f32 accumulation
    x = dropout(x_ref[...], 0)                                   # (tb, 1000) bf16
    h1 = jnp.dot(x, w0_ref[...], preferred_element_type=jnp.float32) + b0_ref[...]
    h1 = jnp.maximum(h1, 0.0)                                    # (tb, 32) f32

    # x_btl_2 = relu(lin1(dropout2d(x_btl_1)))
    h1d = dropout(h1, 1024)
    h2 = jnp.dot(h1d, w1_ref[...], preferred_element_type=jnp.float32) + b1_ref[...]
    h2 = jnp.maximum(h2, 0.0)                                    # (tb, 512) f32

    # x_va = va_regressor(x_btl_2)  (weights padded to 128 output lanes -> dense vst)
    va = jnp.dot(h2, w2_ref[...], preferred_element_type=jnp.float32) + b2_ref[...]

    btl2_ref[...] = h2.astype(btl2_ref.dtype)
    va_ref[...] = va.astype(va_ref.dtype)


def regressor_sr50(x, params, seed=0, training=True, tb_max=512):
    """x: (B, 1000) float32. Returns (x_va (B, 2), x_btl_2 (B, 512))."""
    w0, b0, w1, b1, w2, b2 = params
    B, F = x.shape
    assert F == 1000

    # Batch tile: multiple of 16 (bf16 sublane packing); bounded VMEM, double-buffered DMA.
    tb = _round_up(min(tb_max, _round_up(B, 16)), 16)
    Bp = _round_up(B, tb)

    x_p = x.astype(jnp.bfloat16)
    if Bp != B:
        x_p = jnp.pad(x_p, ((0, Bp - B), (0, 0)))

    w0_b = w0.astype(jnp.bfloat16)                               # (1000, 32) bf16
    w2_p = jnp.pad(w2, ((0, 0), (0, 128 - w2.shape[1])))          # (512, 128)
    b2_p = jnp.pad(b2, ((0, 0), (0, 128 - b2.shape[1])))          # (1, 128)

    seed_arr = jnp.asarray([seed], dtype=jnp.int32)
    kernel = functools.partial(_regressor_sr50_kernel, training=training)

    grid_spec = pltpu.PrefetchScalarGridSpec(
        num_scalar_prefetch=1,
        grid=(Bp // tb,),
        in_specs=[
            pl.BlockSpec((tb, 1000), lambda i, seed: (i, 0)),     # x tile (streamed)
            pl.BlockSpec((1000, 32), lambda i, seed: (0, 0)),     # w0 (resident)
            pl.BlockSpec((1, 32),    lambda i, seed: (0, 0)),     # b0
            pl.BlockSpec((32, 512),  lambda i, seed: (0, 0)),     # w1
            pl.BlockSpec((1, 512),   lambda i, seed: (0, 0)),     # b1
            pl.BlockSpec((512, 128), lambda i, seed: (0, 0)),     # w2 (padded)
            pl.BlockSpec((1, 128),   lambda i, seed: (0, 0)),     # b2 (padded)
        ],
        out_specs=(
            pl.BlockSpec((tb, 128), lambda i, seed: (i, 0)),      # va (padded, lane-dense)
            pl.BlockSpec((tb, 512), lambda i, seed: (i, 0)),      # btl2
        ),
    )

    va_p, btl2_p = pl.pallas_call(
        kernel,
        out_shape=(jax.ShapeDtypeStruct((Bp, 128), jnp.float32),
                   jax.ShapeDtypeStruct((Bp, 512), jnp.float32)),
        grid_spec=grid_spec,
        compiler_params=pltpu.CompilerParams(
            dimension_semantics=("parallel",),
            vmem_limit_bytes=32 * 1024 * 1024),
    )(seed_arr, x_p, w0_b, b0, w1, b1, w2_p, b2_p)

    return va_p[:B, :2], btl2_p[:B]


def init_params(key):
    """Deterministic init mimicking nn.Linear defaults (U(-1/sqrt(fan_in), +1/sqrt(fan_in))).
    Weights are stored as (in_features, out_features)."""
    def linear(key, fan_in, fan_out):
        kw, kb = jax.random.split(key)
        bound = 1.0 / (fan_in ** 0.5)
        w = jax.random.uniform(kw, (fan_in, fan_out), jnp.float32, -bound, bound)
        b = jax.random.uniform(kb, (1, fan_out), jnp.float32, -bound, bound)
        return w, b

    k0, k1, k2 = jax.random.split(key, 3)
    w0, b0 = linear(k0, 1000, 32)
    w1, b1 = linear(k1, 32, 512)
    w2, b2 = linear(k2, 512, 2)
    return (w0, b0, w1, b1, w2, b2)


if __name__ == "__main__":
    key = jax.random.PRNGKey(0)
    k_params, k_x = jax.random.split(key)
    params = init_params(k_params)

    B = 8  # small batch; feature dims fixed by the module (1000 -> 32 -> 512 -> 2)
    x = jax.random.normal(k_x, (B, 1000), dtype=jnp.float32)

    x_va, x_btl_2 = regressor_sr50(x, params, seed=0, training=True)
    jax.block_until_ready((x_va, x_btl_2))

    assert x_va.shape == (B, 2) and x_btl_2.shape == (B, 512)
    print("KERNEL_OK")
</pallas_src>

<mosaic_0001>
module attributes {stable_mosaic.version = 11 : i64} {
  func.func @_regressor_sr50_kernel(%arg0: i32, %arg1: memref<1xi32, #tpu.memory_space<smem>>, %arg2: memref<16x1000xbf16, #tpu.memory_space<vmem>>, %arg3: memref<1000x32xbf16, #tpu.memory_space<vmem>>, %arg4: memref<1x32xf32, #tpu.memory_space<vmem>>, %arg5: memref<32x512xf32, #tpu.memory_space<vmem>>, %arg6: memref<1x512xf32, #tpu.memory_space<vmem>>, %arg7: memref<512x128xf32, #tpu.memory_space<vmem>>, %arg8: memref<1x128xf32, #tpu.memory_space<vmem>>, %arg9: memref<16x128xf32, #tpu.memory_space<vmem>>, %arg10: memref<16x512xf32, #tpu.memory_space<vmem>>) attributes {dimension_semantics = [#tpu.dimension_semantics<parallel>], iteration_bounds = array<i64: 1>, scalar_prefetch = 1 : i64, scratch_operands = 0 : i64, tpu.core_type = #tpu.core_type<tc>, window_params = [{transform_indices = @transform_0, window_bounds = array<i64: 16, 1000>}, {pipeline_mode = #tpu.pipeline_mode<synchronous>, transform_indices = @transform_1, window_bounds = array<i64: 1000, 32>}, {pipeline_mode = #tpu.pipeline_mode<synchronous>, transform_indices = @transform_2, window_bounds = array<i64: 1, 32>}, {pipeline_mode = #tpu.pipeline_mode<synchronous>, transform_indices = @transform_3, window_bounds = array<i64: 32, 512>}, {pipeline_mode = #tpu.pipeline_mode<synchronous>, transform_indices = @transform_4, window_bounds = array<i64: 1, 512>}, {pipeline_mode = #tpu.pipeline_mode<synchronous>, transform_indices = @transform_5, window_bounds = array<i64: 512, 128>}, {pipeline_mode = #tpu.pipeline_mode<synchronous>, transform_indices = @transform_6, window_bounds = array<i64: 1, 128>}, {transform_indices = @transform_7, window_bounds = array<i64: 16, 128>}, {transform_indices = @transform_8, window_bounds = array<i64: 16, 512>}]} {
    %c0 = arith.constant 0 : index
    %0 = memref.load %arg1[%c0] : memref<1xi32, #tpu.memory_space<smem>>
    %c16_i32 = arith.constant 16 : i32
    %1 = arith.muli %arg0, %c16_i32 : i32
    %c0_0 = arith.constant 0 : index
    %c0_1 = arith.constant 0 : index
    %2 = vector.load %arg2[%c0_0, %c0_1] : memref<16x1000xbf16, #tpu.memory_space<vmem>>, vector<16x1000xbf16>
    %3 = tpu.iota {dimensions = array<i32: 0>} : vector<16x1000xi32>
    %4 = tpu.iota {dimensions = array<i32: 1>} : vector<16x1000xi32>
    %5 = vector.broadcast %1 : i32 to vector<16x1000xi32>
    %6 = arith.addi %5, %3 : vector<16x1000xi32>
    %c2048_i32 = arith.constant 2048 : i32
    %7 = vector.broadcast %c2048_i32 : i32 to vector<16x1000xi32>
    %8 = arith.muli %6, %7 : vector<16x1000xi32>
    %c0_i32 = arith.constant 0 : i32
    %9 = vector.broadcast %c0_i32 : i32 to vector<16x1000xi32>
    %10 = arith.addi %4, %9 : vector<16x1000xi32>
    %11 = arith.addi %8, %10 : vector<16x1000xi32>
    %c-1640531527_i32 = arith.constant -1640531527 : i32
    %12 = arith.muli %0, %c-1640531527_i32 : i32
    %13 = vector.broadcast %12 : i32 to vector<16x1000xi32>
    %14 = arith.xori %11, %13 : vector<16x1000xi32>
    %c16_i32_2 = arith.constant 16 : i32
    %15 = vector.broadcast %c16_i32_2 : i32 to vector<16x1000xi32>
    %16 = arith.shrui %14, %15 : vector<16x1000xi32>
    %17 = arith.xori %14, %16 : vector<16x1000xi32>
    %c2146121005_i32 = arith.constant 2146121005 : i32
    %18 = vector.broadcast %c2146121005_i32 : i32 to vector<16x1000xi32>
    %19 = arith.muli %17, %18 : vector<16x1000xi32>
    %c15_i32 = arith.constant 15 : i32
    %20 = vector.broadcast %c15_i32 : i32 to vector<16x1000xi32>
    %21 = arith.shrui %19, %20 : vector<16x1000xi32>
    %22 = arith.xori %19, %21 : vector<16x1000xi32>
    %c-2073254261_i32 = arith.constant -2073254261 : i32
    %23 = vector.broadcast %c-2073254261_i32 : i32 to vector<16x1000xi32>
    %24 = arith.muli %22, %23 : vector<16x1000xi32>
    %c16_i32_3 = arith.constant 16 : i32
    %25 = vector.broadcast %c16_i32_3 : i32 to vector<16x1000xi32>
    %26 = arith.shrui %24, %25 : vector<16x1000xi32>
    %27 = arith.xori %24, %26 : vector<16x1000xi32>
    %c31_i32 = arith.constant 31 : i32
    %28 = vector.broadcast %c31_i32 : i32 to vector<16x1000xi32>
    %29 = arith.shrui %27, %28 : vector<16x1000xi32>
    %c0_i32_4 = arith.constant 0 : i32
    %30 = vector.broadcast %c0_i32_4 : i32 to vector<16x1000xi32>
    %31 = arith.cmpi eq, %29, %30 : vector<16x1000xi32>
    %cst = arith.constant 2.000000e+00 : bf16
    %32 = vector.broadcast %cst : bf16 to vector<16x1000xbf16>
    %33 = arith.mulf %2, %32 : vector<16x1000xbf16>
    %cst_5 = arith.constant 0.000000e+00 : bf16
    %34 = vector.broadcast %cst_5 : bf16 to vector<16x1000xbf16>
    %35 = arith.select %31, %33, %34 : vector<16x1000xi1>, vector<16x1000xbf16>
    %c0_6 = arith.constant 0 : index
    %c0_7 = arith.constant 0 : index
    %36 = vector.load %arg3[%c0_6, %c0_7] : memref<1000x32xbf16, #tpu.memory_space<vmem>>, vector<1000x32xbf16>
    %cst_8 = arith.constant dense<0.000000e+00> : vector<16x32xf32>
    %37 = tpu.matmul %35, %36, %cst_8 {dimension_numbers = #tpu.dot_dimension_numbers<[1], [0], [0], [1], [0, 0, 1, 1], [], []>} : vector<16x1000xbf16>, vector<1000x32xbf16>, vector<16x32xf32> -> vector<16x32xf32>
    %c0_9 = arith.constant 0 : index
    %c0_10 = arith.constant 0 : index
    %38 = vector.load %arg4[%c0_9, %c0_10] : memref<1x32xf32, #tpu.memory_space<vmem>>, vector<1x32xf32>
    %39 = vector.broadcast %38 : vector<1x32xf32> to vector<16x32xf32>
    %40 = arith.addf %37, %39 : vector<16x32xf32>
    %cst_11 = arith.constant 0.000000e+00 : f32
    %41 = vector.broadcast %cst_11 : f32 to vector<16x32xf32>
    %42 = arith.maximumf %40, %41 : vector<16x32xf32>
    %43 = tpu.iota {dimensions = array<i32: 0>} : vector<16x32xi32>
    %44 = tpu.iota {dimensions = array<i32: 1>} : vector<16x32xi32>
    %45 = vector.broadcast %1 : i32 to vector<16x32xi32>
    %46 = arith.addi %45, %43 : vector<16x32xi32>
    %c2048_i32_12 = arith.constant 2048 : i32
    %47 = vector.broadcast %c2048_i32_12 : i32 to vector<16x32xi32>
    %48 = arith.muli %46, %47 : vector<16x32xi32>
    %c1024_i32 = arith.constant 1024 : i32
    %49 = vector.broadcast %c1024_i32 : i32 to vector<16x32xi32>
    %50 = arith.addi %44, %49 : vector<16x32xi32>
    %51 = arith.addi %48, %50 : vector<16x32xi32>
    %c-1640531527_i32_13 = arith.constant -1640531527 : i32
    %52 = arith.muli %0, %c-1640531527_i32_13 : i32
    %53 = vector.broadcast %52 : i32 to vector<16x32xi32>
    %54 = arith.xori %51, %53 : vector<16x32xi32>
    %c16_i32_14 = arith.constant 16 : i32
    %55 = vector.broadcast %c16_i32_14 : i32 to vector<16x32xi32>
    %56 = arith.shrui %54, %55 : vector<16x32xi32>
    %57 = arith.xori %54, %56 : vector<16x32xi32>
    %c2146121005_i32_15 = arith.constant 2146121005 : i32
    %58 = vector.broadcast %c2146121005_i32_15 : i32 to vector<16x32xi32>
    %59 = arith.muli %57, %58 : vector<16x32xi32>
    %c15_i32_16 = arith.constant 15 : i32
    %60 = vector.broadcast %c15_i32_16 : i32 to vector<16x32xi32>
    %61 = arith.shrui %59, %60 : vector<16x32xi32>
    %62 = arith.xori %59, %61 : vector<16x32xi32>
    %c-2073254261_i32_17 = arith.constant -2073254261 : i32
    %63 = vector.broadcast %c-2073254261_i32_17 : i32 to vector<16x32xi32>
    %64 = arith.muli %62, %63 : vector<16x32xi32>
    %c16_i32_18 = arith.constant 16 : i32
    %65 = vector.broadcast %c16_i32_18 : i32 to vector<16x32xi32>
    %66 = arith.shrui %64, %65 : vector<16x32xi32>
    %67 = arith.xori %64, %66 : vector<16x32xi32>
    %c31_i32_19 = arith.constant 31 : i32
    %68 = vector.broadcast %c31_i32_19 : i32 to vector<16x32xi32>
    %69 = arith.shrui %67, %68 : vector<16x32xi32>
    %c0_i32_20 = arith.constant 0 : i32
    %70 = vector.broadcast %c0_i32_20 : i32 to vector<16x32xi32>
    %71 = arith.cmpi eq, %69, %70 : vector<16x32xi32>
    %cst_21 = arith.constant 2.000000e+00 : f32
    %72 = vector.broadcast %cst_21 : f32 to vector<16x32xf32>
    %73 = arith.mulf %42, %72 : vector<16x32xf32>
    %cst_22 = arith.constant 0.000000e+00 : f32
    %74 = vector.broadcast %cst_22 : f32 to vector<16x32xf32>
    %75 = arith.select %71, %73, %74 : vector<16x32xi1>, vector<16x32xf32>
    %c0_23 = arith.constant 0 : index
    %c0_24 = arith.constant 0 : index
    %76 = vector.load %arg5[%c0_23, %c0_24] : memref<32x512xf32, #tpu.memory_space<vmem>>, vector<32x512xf32>
    %cst_25 = arith.constant dense<0.000000e+00> : vector<16x512xf32>
    %77 = tpu.matmul %75, %76, %cst_25 {dimension_numbers = #tpu.dot_dimension_numbers<[1], [0], [0], [1], [0, 0, 1, 1], [], []>} : vector<16x32xf32>, vector<32x512xf32>, vector<16x512xf32> -> vector<16x512xf32>
    %c0_26 = arith.constant 0 : index
    %c0_27 = arith.constant 0 : index
    %78 = vector.load %arg6[%c0_26, %c0_27] : memref<1x512xf32, #tpu.memory_space<vmem>>, vector<1x512xf32>
    %79 = vector.broadcast %78 : vector<1x512xf32> to vector<16x512xf32>
    %80 = arith.addf %77, %79 : vector<16x512xf32>
    %cst_28 = arith.constant 0.000000e+00 : f32
    %81 = vector.broadcast %cst_28 : f32 to vector<16x512xf32>
    %82 = arith.maximumf %80, %81 : vector<16x512xf32>
    %c0_29 = arith.constant 0 : index
    %c0_30 = arith.constant 0 : index
    %83 = vector.load %arg7[%c0_29, %c0_30] : memref<512x128xf32, #tpu.memory_space<vmem>>, vector<512x128xf32>
    %cst_31 = arith.constant dense<0.000000e+00> : vector<16x128xf32>
    %84 = tpu.matmul %82, %83, %cst_31 {dimension_numbers = #tpu.dot_dimension_numbers<[1], [0], [0], [1], [0, 0, 1, 1], [], []>} : vector<16x512xf32>, vector<512x128xf32>, vector<16x128xf32> -> vector<16x128xf32>
    %c0_32 = arith.constant 0 : index
    %c0_33 = arith.constant 0 : index
    %85 = vector.load %arg8[%c0_32, %c0_33] : memref<1x128xf32, #tpu.memory_space<vmem>>, vector<1x128xf32>
    %86 = vector.broadcast %85 : vector<1x128xf32> to vector<16x128xf32>
    %87 = arith.addf %84, %86 : vector<16x128xf32>
    %c0_34 = arith.constant 0 : index
    %c0_35 = arith.constant 0 : index
    %88 = vector.load %arg10[%c0_34, %c0_35] : memref<16x512xf32, #tpu.memory_space<vmem>>, vector<16x512xf32>
    tpu.vector_store %arg10[%c0_34, %c0_35], %82 {strides = array<i32>} : memref<16x512xf32, #tpu.memory_space<vmem>>, vector<16x512xf32>,
    %c0_36 = arith.constant 0 : index
    %c0_37 = arith.constant 0 : index
    %89 = vector.load %arg9[%c0_36, %c0_37] : memref<16x128xf32, #tpu.memory_space<vmem>>, vector<16x128xf32>
    tpu.vector_store %arg9[%c0_36, %c0_37], %87 {strides = array<i32>} : memref<16x128xf32, #tpu.memory_space<vmem>>, vector<16x128xf32>,
    return
  }
  func.func @transform_0(%arg0: i32, %arg1: memref<1xi32, #tpu.memory_space<smem>>) -> (i32, i32) {
    %c0_i32 = arith.constant 0 : i32
    %c0_i32_0 = arith.constant 0 : i32
    return %arg0, %c0_i32 : i32, i32
  }
  func.func @transform_1(%arg0: i32, %arg1: memref<1xi32, #tpu.memory_space<smem>>) -> (i32, i32) {
    %c0_i32 = arith.constant 0 : i32
    %c0_i32_0 = arith.constant 0 : i32
    %c0_i32_1 = arith.constant 0 : i32
    return %c0_i32, %c0_i32_0 : i32, i32
  }
  func.func @transform_2(%arg0: i32, %arg1: memref<1xi32, #tpu.memory_space<smem>>) -> (i32, i32) {
    %c0_i32 = arith.constant 0 : i32
    %c0_i32_0 = arith.constant 0 : i32
    %c0_i32_1 = arith.constant 0 : i32
    return %c0_i32, %c0_i32_0 : i32, i32
  }
  func.func @transform_3(%arg0: i32, %arg1: memref<1xi32, #tpu.memory_space<smem>>) -> (i32, i32) {
    %c0_i32 = arith.constant 0 : i32
    %c0_i32_0 = arith.constant 0 : i32
    %c0_i32_1 = arith.constant 0 : i32
    return %c0_i32, %c0_i32_0 : i32, i32
  }
  func.func @transform_4(%arg0: i32, %arg1: memref<1xi32, #tpu.memory_space<smem>>) -> (i32, i32) {
    %c0_i32 = arith.constant 0 : i32
    %c0_i32_0 = arith.constant 0 : i32
    %c0_i32_1 = arith.constant 0 : i32
    return %c0_i32, %c0_i32_0 : i32, i32
  }
  func.func @transform_5(%arg0: i32, %arg1: memref<1xi32, #tpu.memory_space<smem>>) -> (i32, i32) {
    %c0_i32 = arith.constant 0 : i32
    %c0_i32_0 = arith.constant 0 : i32
    %c0_i32_1 = arith.constant 0 : i32
    return %c0_i32, %c0_i32_0 : i32, i32
  }
  func.func @transform_6(%arg0: i32, %arg1: memref<1xi32, #tpu.memory_space<smem>>) -> (i32, i32) {
    %c0_i32 = arith.constant 0 : i32
    %c0_i32_0 = arith.constant 0 : i32
    %c0_i32_1 = arith.constant 0 : i32
    return %c0_i32, %c0_i32_0 : i32, i32
  }
  func.func @transform_7(%arg0: i32, %arg1: memref<1xi32, #tpu.memory_space<smem>>) -> (i32, i32) {
    %c0_i32 = arith.constant 0 : i32
    %c0_i32_0 = arith.constant 0 : i32
    return %arg0, %c0_i32 : i32, i32
  }
  func.func @transform_8(%arg0: i32, %arg1: memref<1xi32, #tpu.memory_space<smem>>) -> (i32, i32) {
    %c0_i32 = arith.constant 0 : i32
    %c0_i32_0 = arith.constant 0 : i32
    return %arg0, %c0_i32 : i32, i32
  }
}

</mosaic_0001>

<bundles_post_ra>
// kernel: tpu_custom_call.1
= control target key start
LH: loop header
LB: loop body
LE: loop exit
PB: predicated region body
PF: predicated region fallthrough
CT: control target
= control target key end

     0   :  { %16 = vsyncpa [#allocation5], 0  ;;  %s2618_s0 = inlined_call_operand.<no memory space> [shape: s32[1], index: 0, kind: input, shape index: {}]   ;;  %s2619_s1 = inlined_call_operand.hbm [shape: bf16[16,1000], index: 1, kind: input, shape index: {}]   ;;  %s2620_s2 = inlined_call_operand.vmem [shape: bf16[1000,32], index: 2, kind: input, shape index: {}]   ;;  %s2621_s3 = inlined_call_operand.vmem [shape: f32[1,32], index: 3, kind: input, shape index: {}]   ;;  %s2622_s4 = inlined_call_operand.vmem [shape: f32[32,512], index: 4, kind: input, shape index: {}]   ;;  %s2623_s5 = inlined_call_operand.vmem [shape: f32[1,512], index: 5, kind: input, shape index: {}]   ;;  %s2624_s6 = inlined_call_operand.vmem [shape: f32[512,128], index: 6, kind: input, shape index: {}]   ;;  %s2625_s7 = inlined_call_operand.vmem [shape: f32[1,128], index: 7, kind: input, shape index: {}]   ;;  %s2626_s8 = inlined_call_operand.hbm [shape: f32[16,128], index: 8, kind: output, shape index: {0}]   ;;  %s2627_s9 = inlined_call_operand.hbm [shape: f32[16,512], index: 9, kind: output, shape index: {1}]  }
   0x1   :  { %17 = vsyncpa [#allocation6], 0 }
   0x2   :  { %18 = vsyncpa [#allocation9], 0  ;;  %s1957_s30 = smov [#allocation4]   ;;  %s1885_s13 = scalar_lea.hbm %s2619_s1, 1024 }
   0x3   :  { %s24_s10 = sshll.u32 %s1957_s30, 4  ;;  %p1886_p0 = scmp.ne.s32.totalorder %s2619_s1, %s1885_s13  ;;  %s25_s10 = int_to_ptr.vmem [resolvable:$true] %s24_s10 }
   0x4   :  { %p1889_p1 = scmp.lt.u32.totalorder %s1885_s13, %s2619_s1 }
   0x6   :  { %p1891_p2 = pnand %p1889_p1, %p1886_p0 }
   0x8   :  { %1894 = shalt.err (!%p1891_p2)
}
   0x9   :  { %s1895_s18 = scalar_lea.vmem %s25_s10, 1024  ;;  %p1900_p4 = scmp.lt.s32.totalorder %s25_s10, %s25_s10 }
   0xa   :  { %p1896_p3 = scmp.ne.s32.totalorder %s25_s10, %s1895_s18  ;;  %p1901_p5 = scmp.lt.s32.totalorder %s1895_s18, %s1895_s18 }
   0xc   :  { %p1902_p6 = por %p1901_p5, %p1900_p4 }
   0xe   :  { %p1903_p7 = pnand %p1902_p6, %p1896_p3 }
  0x10   :  { %1906 = shalt.err (!%p1903_p7)
}
  0x11   :  { %s1958_s19 = smov 512   ;;  %s1959_s20 = smov 32  }
  0x12   :  { %30 = dma.hbm_to_vmem [thread:$0]  %s2619_s1, 1024, %s25_s10, [#allocation5], %s1958_s19, %s1958_s19, %s1959_s20  }
  0x13   :  { %1951 = dma.done.wait [#allocation5], 1024  }
  0x14   :  { %1952 = vsyncadd [#allocation5], 4294966272  ;;  %v58_v0 = vlaneseq  ;;  %s91_s25 = smul.u32 2654435769, %s2618_s0  ;;  %v1822_v1 = vld [vmem:[%s2620_s2 + $0x40] sm:$0xff]   ;;  %v1826_v6 = vld [vmem:[%s2620_s2 + $0x48] sm:$0xff]  }
  0x15   :  { %v1823_v2 = vld [vmem:[%s2620_s2 + $0xc0] sm:$0xff]   ;;  %1591 = vmatprep.subr.bf16.mxu0 %v1822_v1  ;;  %v1827_v7 = vld [vmem:[%s2620_s2 + $0xc8] sm:$0xff]   ;;  %v1830_v12 = vld [vmem:[%s2620_s2 + $0x50] sm:$0xff]  }
  0x16   :  { %v1824_v3 = vld [vmem:[%s2620_s2] sm:$0xff]   ;;  %1613 = vmatprep.subr.bf16.mxu1 %v1823_v2  ;;  %v2046_v5 = vshrl.u32 %v58_v0, 7  ;;  %v1828_v8 = vld [vmem:[%s2620_s2 + $0x8] sm:$0xff]   ;;  %v2057_v9 = vand.u32 127, %v58_v0  ;;  %v1831_v13 = vld [vmem:[%s2620_s2 + $0xd0] sm:$0xff]   ;;  %v2098_v25 = vstv %s91_s25 }
  0x17   :  { %v1825_v4 = vld [vmem:[%s2620_s2 + $0x80] sm:$0xff]   ;;  %1592 = vmatpush3.bf16.msra.mxu0 %v1824_v3  ;;  %v1829_v10 = vld [vmem:[%s2620_s2 + $0x88] sm:$0xff]   ;;  %v1832_v15 = vld [vmem:[%s2620_s2 + $0x10] sm:$0xff]  }
  0x18   :  { %1614 = vmatpush3.bf16.msra.mxu1 %v1825_v4  ;;  %1593 = vmatprep.subr.bf16.mxu0 %v1826_v6  ;;  %v60_v11 = vadd.s32 8, %v2046_v5  ;;  %v2070_v14 = vmul.u32 2048, %v2046_v5  ;;  %v63_v16 = vadd.s32 128, %v2057_v9  ;;  %v1833_v17 = vld [vmem:[%s2620_s2 + $0x90] sm:$0xff]   ;;  %v1834_v19 = vld [vmem:[%s2620_s2 + $0x58] sm:$0xff]   ;;  %v64_v22 = vadd.s32 256, %v2057_v9 }
  0x19   :  { %1615 = vmatprep.subr.bf16.mxu1 %v1827_v7  ;;  %v1835_v20 = vld [vmem:[%s2620_s2 + $0xd8] sm:$0xff]   ;;  %v65_v26 = vadd.s32 384, %v2057_v9  ;;  %v1838_v29 = vld [vmem:[%s2620_s2 + $0x60] sm:$0xff]   ;;  %v1842_v40 = vld [vmem:[%s2620_s2 + $0x68] sm:$0xff]   ;;  %v2131_v43 = vadd.s32 512, %v2057_v9 }
  0x1a   :  { %v2079_v18 = vmul.u32 2048, %v60_v11  ;;  %v75_v21 = vadd.s32 %v2070_v14, %v2057_v9  ;;  %v1836_v23 = vld [vmem:[%s2620_s2 + $0x18] sm:$0xff]   ;;  %v76_v24 = vadd.s32 %v2070_v14, %v63_v16  ;;  %v1839_v31 = vld [vmem:[%s2620_s2 + $0xe0] sm:$0xff]   ;;  %v77_v33 = vadd.s32 %v2070_v14, %v64_v22  ;;  %v1843_v44 = vld [vmem:[%s2620_s2 + $0xe8] sm:$0xff]  }
  0x1b   :  { %1594 = vmatpush3.bf16.msra.mxu0 %v1828_v8  ;;  %v1837_v27 = vld [vmem:[%s2620_s2 + $0x98] sm:$0xff]   ;;  %v1840_v34 = vld [vmem:[%s2620_s2 + $0x20] sm:$0xff]   ;;  %v78_v36 = vadd.s32 %v2070_v14, %v65_v26  ;;  %v1844_v47 = vld [vmem:[%s2620_s2 + $0x28] sm:$0xff]   ;;  %v79_v58 = vadd.s32 %v2070_v14, %v2131_v43 }
  0x1c   :  { %1616 = vmatpush3.bf16.msra.mxu1 %v1829_v10  ;;  %1595 = vmatprep.subr.bf16.mxu0 %v1830_v12  ;;  %v83_v28 = vadd.s32 %v2079_v18, %v2057_v9  ;;  %v84_v30 = vadd.s32 %v2079_v18, %v63_v16  ;;  %v93_v32 = vxor.u32 %v2098_v25, %v75_v21  ;;  %v1841_v37 = vld [vmem:[%s2620_s2 + $0xa0] sm:$0xff]   ;;  %v1845_v50 = vld [vmem:[%s2620_s2 + $0xa8] sm:$0xff]   ;;  %v1846_v53 = vld [vmem:[%s2620_s2 + $0x70] sm:$0xff]  }
  0x1d   :  { %1617 = vmatprep.subr.bf16.mxu1 %v1831_v13  ;;  %v94_v35 = vxor.u32 %v2098_v25, %v76_v24  ;;  %v85_v39 = vadd.s32 %v2079_v18, %v64_v22  ;;  %v86_v42 = vadd.s32 %v2079_v18, %v65_v26  ;;  %v95_v46 = vxor.u32 %v2098_v25, %v77_v33  ;;  %v1847_v56 = vld [vmem:[%s2620_s2 + $0xf0] sm:$0xff]   ;;  %v1850_v63 = vld [vmem:[%s2620_s2 + $0x78] sm:$0xff]   ;;  %v2178_v16 = vld [vmem:[#allocation4] sm:$0xff] }
  0x1e   :  { %v101_v38 = vxor.u32 %v2098_v25, %v83_v28  ;;  %v102_v41 = vxor.u32 %v2098_v25, %v84_v30  ;;  %v109_v45 = vshrl.u32 %v93_v32, 16  ;;  %v96_v49 = vxor.u32 %v2098_v25, %v78_v36  ;;  %v1848_v59 = vld [vmem:[%s2620_s2 + $0x30] sm:$0xff]   ;;  %v1851_v3 = vld [vmem:[%s2620_s2 + $0xf8] sm:$0xff]  }
  0x1f   :  { %1596 = vmatpush3.bf16.msra.mxu0 %v1832_v15  ;;  %v110_v48 = vshrl.u32 %v94_v35, 16  ;;  %v103_v52 = vxor.u32 %v2098_v25, %v85_v39  ;;  %v104_v55 = vxor.u32 %v2098_v25, %v86_v42  ;;  %v111_v57 = vshrl.u32 %v95_v46, 16  ;;  %v1849_v61 = vld [vmem:[%s2620_s2 + $0xb0] sm:$0xff]   ;;  %v1852_v8 = vld [vmem:[%s2620_s2 + $0x38] sm:$0xff]  }
  0x20   :  { %1618 = vmatpush3.bf16.msra.mxu1 %v1833_v17  ;;  %1597 = vmatprep.subr.bf16.mxu0 %v1834_v19  ;;  %v117_v51 = vshrl.u32 %v101_v38, 16  ;;  %v118_v54 = vshrl.u32 %v102_v41, 16  ;;  %v112_v60 = vshrl.u32 %v96_v49, 16  ;;  %v125_v0 = vxor.u32 %v109_v45, %v93_v32  ;;  %v1853_v11 = vld [vmem:[%s2620_s2 + $0xb8] sm:$0xff]   ;;  %v2180_v17 = vld [vmem:[#allocation4 + $0x20] sm:$0xff] }
  0x21   :  { %1619 = vmatprep.subr.bf16.mxu1 %v1835_v20  ;;  %v119_v62 = vshrl.u32 %v103_v52, 16  ;;  %v126_v1 = vxor.u32 %v110_v48, %v94_v35  ;;  %v120_v2 = vshrl.u32 %v104_v55, 16  ;;  %v2167_v7 = vxor.u32 %v2098_v25, %v79_v58 }
  0x22   :  { %v133_v4 = vxor.u32 %v117_v51, %v101_v38  ;;  %v134_v6 = vxor.u32 %v118_v54, %v102_v41  ;;  %v127_v10 = vxor.u32 %v111_v57, %v95_v46  ;;  %v128_v12 = vxor.u32 %v112_v60, %v96_v49 }
  0x23   :  { %1598 = vmatpush3.bf16.msra.mxu0 %v1836_v23  ;;  %v135_v13 = vxor.u32 %v119_v62, %v103_v52  ;;  %v2176_v15 = vadd.s32 640, %v2057_v9  ;;  %v141_v19 = vmul.u32 2146121005, %v125_v0  ;;  %v142_v20 = vmul.u32 2146121005, %v126_v1 }
  0x24   :  { %1620 = vmatpush3.bf16.msra.mxu1 %v1837_v27  ;;  %1599 = vmatprep.subr.bf16.mxu0 %v1838_v29  ;;  %v136_v21 = vxor.u32 %v120_v2, %v104_v55  ;;  %v149_v22 = vmul.u32 2146121005, %v133_v4  ;;  %v150_v23 = vmul.u32 2146121005, %v134_v6  ;;  %v269_v24 = vmul.bf16 1073758208, %v2178_v16 }
  0x25   :  { %1621 = vmatprep.subr.bf16.mxu1 %v1839_v31  ;;  %v113_v26 = vshrl.u32 %v2167_v7, 16  ;;  %v157_v27 = vshrl.u32 %v141_v19, 15  ;;  %v158_v28 = vshrl.u32 %v142_v20, 15  ;;  %v273_v29 = vmul.bf16 1073758208, %v2180_v17 }
  0x26   :  { %v143_v30 = vmul.u32 2146121005, %v127_v10  ;;  %v1960_v31 = vmov 0   ;;  %v165_v32 = vshrl.u32 %v149_v22, 15  ;;  %v166_v33 = vshrl.u32 %v150_v23, 15 }
  0x27   :  { %1600 = vmatpush3.bf16.msra.mxu0 %v1840_v34  ;;  %v144_v34 = vmul.u32 2146121005, %v128_v12  ;;  %v151_v35 = vmul.u32 2146121005, %v135_v13  ;;  %v173_v36 = vxor.u32 %v157_v27, %v141_v19  ;;  %v87_v17 = vadd.s32 %v2079_v18, %v2131_v43  ;;  %v1860_v43 = vld [vmem:[%s2620_s2 + $0x150] sm:$0xff]  }
  0x28   :  { %1622 = vmatpush3.bf16.msra.mxu1 %v1841_v37  ;;  %1601 = vmatprep.subr.bf16.mxu0 %v1842_v40  ;;  %v174_v37 = vxor.u32 %v158_v28, %v142_v20  ;;  %v152_v38 = vmul.u32 2146121005, %v136_v21  ;;  %v159_v39 = vshrl.u32 %v143_v30, 15  ;;  %v1854_v40 = vld [vmem:[%s2620_s2 + $0x140] sm:$0xff]   ;;  %v181_v41 = vxor.u32 %v165_v32, %v149_v22  ;;  %v51_v20 = vld [vmem:[#allocation4 + $0x8] sm:$0xff] }
  0x29   :  { %1623 = vmatprep.subr.bf16.mxu1 %v1843_v44  ;;  %v182_v42 = vxor.u32 %v166_v33, %v150_v23  ;;  %v160_v44 = vshrl.u32 %v144_v34, 15  ;;  %v167_v45 = vshrl.u32 %v151_v35, 15  ;;  %v189_v46 = vmul.u32 2221713035, %v173_v36  ;;  %v55_v23 = vld [vmem:[#allocation4 + $0x28] sm:$0xff]  ;;  %v1855_v36 = vld [vmem:[%s2620_s2 + $0x100] sm:$0xff]  }
  0x2a   :  { %v168_v48 = vshrl.u32 %v152_v38, 15  ;;  %v175_v49 = vxor.u32 %v159_v39, %v143_v30 }
  0x2b   :  { %1602 = vmatpush3.bf16.msra.mxu0 %v1844_v47  ;;  %v190_v47 = vmul.u32 2221713035, %v174_v37  ;;  %v198_v51 = vmul.u32 2221713035, %v182_v42  ;;  %v176_v52 = vxor.u32 %v160_v44, %v144_v34  ;;  %v205_v54 = vshrl.u32 %v189_v46, 16 }
  0x2c   :  { %1624 = vmatpush3.bf16.msra.mxu1 %v1845_v50  ;;  %1603 = vmatprep.subr.bf16.mxu0 %v1846_v53  ;;  %v197_v50 = vmul.u32 2221713035, %v181_v41  ;;  %v183_v53 = vxor.u32 %v167_v45, %v151_v35  ;;  %v191_v57 = vmul.u32 2221713035, %v175_v49  ;;  %v270_v35 = vmul.bf16 1073758208, %v51_v20  ;;  %v1869_v20 = vld [vmem:[%s2620_s2 + $0x168] sm:$0xff]  }
  0x2d   :  { %1625 = vmatprep.subr.bf16.mxu1 %v1847_v56  ;;  %v206_v55 = vshrl.u32 %v190_v47, 16  ;;  %v184_v56 = vxor.u32 %v168_v48, %v152_v38  ;;  %v192_v60 = vmul.u32 2221713035, %v176_v52  ;;  %v221_v62 = vxor.u32 %v205_v54, %v189_v46  ;;  %v1856_v46 = vld [vmem:[%s2620_s2 + $0x180] sm:$0xff]   ;;  %v1858_v48 = vld [vmem:[%s2620_s2 + $0x108] sm:$0xff]   ;;  %v1863_v54 = vld [vmem:[%s2620_s2 + $0x158] sm:$0xff]  }
  0x2e   :  { %v213_v58 = vshrl.u32 %v197_v50, 16  ;;  %v207_v1 = vshrl.u32 %v191_v57, 16  ;;  %v274_v38 = vmul.bf16 1073758208, %v55_v23  ;;  %v80_v41 = vadd.s32 %v2070_v14, %v2176_v15 }
  0x2f   :  { %1604 = vmatpush3.bf16.msra.mxu0 %v1848_v59  ;;  %v214_v59 = vshrl.u32 %v198_v51, 16  ;;  %v200_v0 = vmul.u32 2221713035, %v184_v56  ;;  %v208_v4 = vshrl.u32 %v192_v60, 16  ;;  %v68_v49 = vadd.s32 768, %v2057_v9 }
  0x30   :  { %1626 = vmatpush3.bf16.msra.mxu1 %v1849_v61  ;;  %1605 = vmatprep.subr.bf16.mxu0 %v1850_v63  ;;  %v199_v61 = vmul.u32 2221713035, %v183_v53  ;;  %v222_v63 = vxor.u32 %v206_v55, %v190_v47  ;;  %v229_v2 = vxor.u32 %v213_v58, %v197_v50  ;;  %v223_v12 = vxor.u32 %v207_v1, %v191_v57  ;;  %v1861_v53 = vld [vmem:[%s2620_s2 + $0x110] sm:$0xff]   ;;  %v1866_v1 = vld [vmem:[%s2620_s2 + $0x160] sm:$0xff]  }
  0x31   :  { %1627 = vmatprep.subr.bf16.mxu1 %v1851_v3  ;;  %v230_v3 = vxor.u32 %v214_v59, %v198_v51  ;;  %v224_v21 = vxor.u32 %v208_v4, %v192_v60  ;;  %v129_v47 = vxor.u32 %v113_v26, %v2167_v7  ;;  %v1859_v7 = vld [vmem:[%s2620_s2 + $0x188] sm:$0xff]   ;;  %v105_v26 = vxor.u32 %v2098_v25, %v87_v17 }
  0x32   :  { %v215_v6 = vshrl.u32 %v199_v61, 16  ;;  %v238_v10 = vshrl.u32 %v222_v63, 31  ;;  %v245_v13 = vshrl.u32 %v229_v2, 31  ;;  %v239_v28 = vshrl.u32 %v223_v12, 31  ;;  %v1864_v63 = vld [vmem:[%s2620_s2 + $0x118] sm:$0xff]  }
  0x33   :  { %1606 = vmatpush3.bf16.msra.mxu0 %v1852_v8  ;;  %v237_v8 = vshrl.u32 %v221_v62, 31  ;;  %v246_v19 = vshrl.u32 %v230_v3, 31  ;;  %v240_v30 = vshrl.u32 %v224_v21, 31  ;;  %v69_v51 = vadd.s32 896, %v2057_v9 }
  0x34   :  { %1628 = vmatpush3.bf16.msra.mxu1 %v1853_v11  ;;  %1635 = vmatprep.subr.bf16.mxu0 %v1854_v40  ;;  %v216_v11 = vshrl.u32 %v200_v0, 16  ;;  %v231_v22 = vxor.u32 %v215_v6, %v199_v61  ;;  %vm254_vm1 = vcmp.eq.s32.totalorder %v238_v10, 0  ;;  %vm261_vm2 = vcmp.eq.s32.totalorder %v245_v13, 0  ;;  %v1862_v61 = vld [vmem:[%s2620_s2 + $0x190] sm:$0xff]   ;;  %v1867_v13 = vld [vmem:[%s2620_s2 + $0x120] sm:$0xff]  }
  0x35   :  { %970 = vmatprep.subr.bf16.mxu1 %v1960_v31  ;;  %vm253_vm0 = vcmp.eq.s32.totalorder %v237_v8, 0  ;;  %vm262_vm3 = vcmp.eq.s32.totalorder %v246_v19, 0  ;;  %vm255_vm6 = vcmp.eq.s32.totalorder %v239_v28, 0  ;;  %vm256_vm7 = vcmp.eq.s32.totalorder %v240_v30, 0 }
  0x36   :  { %v232_v27 = vxor.u32 %v216_v11, %v200_v0  ;;  %vm277_vm4 = vmpackc.low %vm254_vm1, %vm253_vm0  ;;  %v247_v32 = vshrl.u32 %v231_v22, 31  ;;  %v145_v52 = vmul.u32 2146121005, %v129_v47  ;;  %v81_v56 = vadd.s32 %v2070_v14, %v68_v49  ;;  %v1865_v11 = vld [vmem:[%s2620_s2 + $0x198] sm:$0xff]  }
  0x37   :  { %vm281_vm5 = vmpackc.low %vm262_vm3, %vm261_vm2  ;;  %v285_v33 = vsel %vm277_vm4, %v269_v24, 0  ;;  %v1857_v24 = vld [vmem:[%s2620_s2 + $0x148] sm:$0xff]   ;;  %v121_v57 = vshrl.u32 %v105_v26, 16  ;;  %v82_v59 = vadd.s32 %v2070_v14, %v69_v51  ;;  %v89_v60 = vadd.s32 %v2079_v18, %v68_v49 }
  0x38   :  { %v248_v34 = vshrl.u32 %v232_v27, 31  ;;  %v289_v37 = vsel %vm281_vm5, %v273_v29, 0  ;;  %vm263_vm8 = vcmp.eq.s32.totalorder %v247_v32, 0  ;;  %vm278_vm10 = vmpackc.low %vm256_vm7, %vm255_vm6  ;;  %v88_v29 = vadd.s32 %v2079_v18, %v2176_v15  ;;  %v1868_v32 = vld [vmem:[%s2620_s2 + $0x1a0] sm:$0xff]  }
  0x39   :  { %v1514_v39 = vcombine.low %v285_v33, %v289_v37  ;;  %v1515_v40 = vcombine.high %v285_v33, %v289_v37  ;;  %v286_v16 = vsel %vm278_vm10, %v270_v35, 0  ;;  %v98_v15 = vxor.u32 %v2098_v25, %v80_v41  ;;  %v1870_v35 = vld [vmem:[%s2620_s2 + $0x128] sm:$0xff]   ;;  %v1873_v41 = vld [vmem:[%s2620_s2 + $0x130] sm:$0xff]  }
  0x3a   :  { %vm264_vm9 = vcmp.eq.s32.totalorder %v248_v34, 0  ;;  %v106_v50 = vxor.u32 %v2098_v25, %v88_v29  ;;  %v161_v62 = vshrl.u32 %v145_v52, 15  ;;  %v90_v0 = vadd.s32 %v2079_v18, %v69_v51  ;;  %v1875_v29 = vld [vmem:[%s2620_s2 + $0x178] sm:$0xff]  }
  0x3b   :  { %vm282_vm11 = vmpackc.low %vm264_vm9, %vm263_vm8  ;;  %879 = vmatprep.mubr.bf16.mxu0 %v1515_v40  ;;  %v114_v55 = vshrl.u32 %v98_v15, 16  ;;  %v99_v3 = vxor.u32 %v2098_v25, %v81_v56  ;;  %v137_v4 = vxor.u32 %v121_v57, %v105_v26  ;;  %v100_v8 = vxor.u32 %v2098_v25, %v82_v59  ;;  %v1872_v40 = vld [vmem:[%s2620_s2 + $0x170] sm:$0xff]  }
  0x3c   :  { %v290_v42 = vsel %vm282_vm11, %v274_v38, 0  ;;  %880 = vmatmul.mubr.bf16.vlgmr.msra.gmra.mrb[0].mxu0 %v1514_v39  ;;  %v122_v58 = vshrl.u32 %v106_v50, 16  ;;  %v107_v10 = vxor.u32 %v2098_v25, %v89_v60  ;;  %v177_v12 = vxor.u32 %v161_v62, %v145_v52  ;;  %v1871_v39 = vld [vmem:[%s2620_s2 + $0x1a8] sm:$0xff]  }
  0x3d   :  { %v1516_v44 = vcombine.low %v286_v16, %v290_v42  ;;  %v1517_v45 = vcombine.high %v286_v16, %v290_v42  ;;  %1636 = vmatpush3.bf16.msra.mxu0 %v1855_v36  ;;  %v130_v2 = vxor.u32 %v114_v55, %v98_v15  ;;  %v108_v19 = vxor.u32 %v2098_v25, %v90_v0  ;;  %v1050_v0 = vld [vmem:[%s2622_s4 + $0x40] sm:$0xff] }
  0x3e   :  { %1637 = vmatprep.subr.bf16.mxu0 %v1857_v24  ;;  %v138_v6 = vxor.u32 %v122_v58, %v106_v50  ;;  %v115_v22 = vshrl.u32 %v99_v3, 16  ;;  %v153_v23 = vmul.u32 2146121005, %v137_v4  ;;  %v116_v28 = vshrl.u32 %v100_v8, 16  ;;  %v1876_v58 = vld [vmem:[%s2620_s2 + $0x138] sm:$0xff]  }
  0x3f   :  { %920 = vmatprep.mubr.bf16.mxu1 %v1517_v45  ;;  %v146_v21 = vmul.u32 2146121005, %v130_v2  ;;  %v123_v30 = vshrl.u32 %v107_v10, 16  ;;  %v193_v34 = vmul.u32 2221713035, %v177_v12  ;;  %v124_v38 = vshrl.u32 %v108_v19, 16 }
  0x40   :  { %921 = vmatmul.mubr.bf16.vlgmr.msra.gmra.mrb[0].mxu1 %v1516_v44  ;;  %v154_v27 = vmul.u32 2146121005, %v138_v6  ;;  %v169_v36 = vshrl.u32 %v153_v23, 15  ;;  %v52_v44 = vld [vmem:[#allocation4 + $0x10] sm:$0xff]  ;;  %v131_v15 = vxor.u32 %v115_v22, %v99_v3  ;;  %v132_v49 = vxor.u32 %v116_v28, %v100_v8 }
  0x41   :  { %971 = vmatpush1.bf16.msra.mxu1 %v1856_v46  ;;  %1638 = vmatpush3.bf16.msra.mxu0 %v1858_v48  ;;  %v162_v33 = vshrl.u32 %v146_v21, 15  ;;  %v209_v24 = vshrl.u32 %v193_v34, 16  ;;  %v56_v45 = vld [vmem:[#allocation4 + $0x30] sm:$0xff]  ;;  %v139_v50 = vxor.u32 %v123_v30, %v107_v10  ;;  %v140_v51 = vxor.u32 %v124_v38, %v108_v19  ;;  %v1877_v10 = vld [vmem:[%s2620_s2 + $0x1b8] sm:$0xff]  }
  0x42   :  { %972 = vmatprep.subr.bf16.mxu1 %v1960_v31  ;;  %1639 = vmatprep.subr.bf16.mxu0 %v1860_v43  ;;  %v170_v37 = vshrl.u32 %v154_v27, 15  ;;  %v185_v42 = vxor.u32 %v169_v36, %v153_v23  ;;  %v271_v56 = vmul.bf16 1073758208, %v52_v44  ;;  %v275_v57 = vmul.bf16 1073758208, %v56_v45  ;;  %v53_v38 = vld [vmem:[#allocation4 + $0x18] sm:$0xff] }
  0x43   :  { %v178_v16 = vxor.u32 %v162_v33, %v146_v21  ;;  %v225_v47 = vxor.u32 %v209_v24, %v193_v34  ;;  %v148_v62 = vmul.u32 2146121005, %v132_v49  ;;  %v156_v2 = vmul.u32 2146121005, %v140_v51  ;;  %v1878_v33 = vld [vmem:[%s2620_s2 + $0x1c0] sm:$0xff]  }
  0x44   :  { %v186_v17 = vxor.u32 %v170_v37, %v154_v27  ;;  %v201_v48 = vmul.u32 2221713035, %v185_v42  ;;  %v1879_v42 = vld [vmem:[%s2620_s2 + $0x1c8] sm:$0xff]   ;;  %vm839_vm8 = vcmask 850944   ;;  %v1882_v51 = vld [vmem:[%s2620_s2 + $0x1e0] sm:$0xff]   ;;  %vm843_vm9 = vcmask 1043456  }
  0x45   :  { %973 = vmatpush1.bf16.msra.mxu1 %v1859_v7  ;;  %1640 = vmatpush3.bf16.msra.mxu0 %v1861_v53  ;;  %v194_v46 = vmul.u32 2221713035, %v178_v16  ;;  %v241_v26 = vshrl.u32 %v225_v47, 31  ;;  %v164_v8 = vshrl.u32 %v148_v62, 15  ;;  %v172_v12 = vshrl.u32 %v156_v2, 15  ;;  %v57_v16 = vld [vmem:[#allocation4 + $0x38] sm:$0xff] }
  0x46   :  { %974 = vmatprep.subr.bf16.mxu1 %v1960_v31  ;;  %1641 = vmatprep.subr.bf16.mxu0 %v1863_v54  ;;  %v202_v43 = vmul.u32 2221713035, %v186_v17  ;;  %v217_v52 = vshrl.u32 %v201_v48, 16  ;;  %v1874_v54 = vld [vmem:[%s2620_s2 + $0x1b0] sm:$0xff]   ;;  %vm1080_vm11 = vcmask 261120  }
  0x47   :  { %v210_v7 = vshrl.u32 %v194_v46, 16  ;;  %vm2287_vm12 = vcmp.eq.s32.totalorder %v241_v26, 0  ;;  %v180_v19 = vxor.u32 %v164_v8, %v148_v62  ;;  %v188_v22 = vxor.u32 %v172_v12, %v156_v2  ;;  %v1055_v62 = vld [vmem:[%s2622_s4 + $0x68] sm:$0xff] }
  0x48   :  { %v218_v53 = vshrl.u32 %v202_v43, 16  ;;  %v233_v59 = vxor.u32 %v217_v52, %v201_v48  ;;  %v1883_v52 = vld [vmem:[%s2620_s2 + $0x1e8] sm:$0xff]   ;;  %v1961_v8 = vmov 0.0  }
  0x49   :  { %975 = vmatpush1.bf16.msra.mxu1 %v1862_v61  ;;  %1642 = vmatpush3.bf16.msra.mxu0 %v1864_v63  ;;  %v226_v55 = vxor.u32 %v210_v7, %v194_v46  ;;  %v147_v61 = vmul.u32 2146121005, %v131_v15  ;;  %v196_v28 = vmul.u32 2221713035, %v180_v19  ;;  %v272_v46 = vmul.bf16 1073758208, %v53_v38  ;;  %v1880_v15 = vld [vmem:[%s2620_s2 + $0x1d0] sm:$0xff]  }
  0x4a   :  { %976 = vmatprep.subr.bf16.mxu1 %v1960_v31  ;;  %1643 = vmatprep.subr.bf16.mxu0 %v1866_v1  ;;  %v234_v60 = vxor.u32 %v218_v53, %v202_v43  ;;  %v155_v1 = vmul.u32 2146121005, %v139_v50  ;;  %v249_v3 = vshrl.u32 %v233_v59, 31  ;;  %v276_v43 = vmul.bf16 1073758208, %v57_v16  ;;  %v1881_v50 = vld [vmem:[%s2620_s2 + $0x1d8] sm:$0xff]   ;;  %v1042_v59 = vld [vmem:[%s2622_s4] sm:$0xff] }
  0x4b   :  { %v242_v63 = vshrl.u32 %v226_v55, 31  ;;  %v163_v6 = vshrl.u32 %v147_v61, 15  ;;  %v212_v37 = vshrl.u32 %v196_v28, 16  ;;  %v1884_v53 = vld [vmem:[%s2620_s2 + $0x1f0] ss:$0 sps:$4 sm:$0xff]   ;;  %v1282_v19 = vld [vmem:[%s2624_s6 + $0x108] sm:$0xff] }
  0x4c   :  { %v250_v4 = vshrl.u32 %v234_v60, 31  ;;  %vm265_vm14 = vcmp.eq.s32.totalorder %v249_v3, 0  ;;  %v1045_v3 = vld [vmem:[%s2622_s4 + $0x18] sm:$0xff]  ;;  %v1303_v38 = vld [vmem:[%s2624_s6 + $0x1b0] sm:$0xff] }
  0x4d   :  { %977 = vmatpush1.bf16.msra.mxu1 %v1865_v11  ;;  %1644 = vmatpush3.bf16.msra.mxu0 %v1867_v13  ;;  %vm258_vm13 = vcmp.eq.s32.totalorder %v242_v63, 0  ;;  %v171_v11 = vshrl.u32 %v155_v1, 15  ;;  %v179_v13 = vxor.u32 %v163_v6, %v147_v61  ;;  %v1051_v61 = vld [vmem:[%s2622_s4 + $0x48] sm:$0xff]  ;;  %v1287_v16 = vld [vmem:[%s2624_s6 + $0x130] sm:$0xff] }
  0x4e   :  { %978 = vmatprep.subr.bf16.mxu1 %v1960_v31  ;;  %1645 = vmatprep.subr.bf16.mxu0 %v1869_v20  ;;  %vm266_vm15 = vcmp.eq.s32.totalorder %v250_v4, 0  ;;  %vm279_vm0 = vmpackc.low %vm258_vm13, %vm2287_vm12  ;;  %v1737_v63 = vpack.c.bf16 %v1055_v62, %v1051_v61  ;;  %v1049_v4 = vld [vmem:[%s2622_s4 + $0x38] sm:$0xff] }
  0x4f   :  { %vm283_vm1 = vmpackc.low %vm266_vm15, %vm265_vm14  ;;  %v287_v20 = vsel %vm279_vm0, %v271_v56, 0  ;;  %v187_v21 = vxor.u32 %v171_v11, %v155_v1  ;;  %v195_v27 = vmul.u32 2221713035, %v179_v13  ;;  %v1043_v56 = vld [vmem:[%s2622_s4 + $0x8] sm:$0xff]  ;;  %v1054_v1 = vld [vmem:[%s2622_s4 + $0x60] sm:$0xff]  ;;  %v1741_v6 = vpack.c.bf16 %v1049_v4, %v1045_v3 }
  0x50   :  { %v291_v23 = vsel %vm283_vm1, %v275_v57, 0  ;;  %v1047_v57 = vld [vmem:[%s2622_s4 + $0x28] sm:$0xff]  ;;  %v1739_v2 = vpack.c.bf16 %v1054_v1, %v1050_v0  ;;  %v1281_v13 = vld [vmem:[%s2624_s6 + $0x100] sm:$0xff] }
  0x51   :  { %979 = vmatpush1.bf16.msra.mxu1 %v1868_v32  ;;  %1646 = vmatpush3.bf16.msra.mxu0 %v1870_v35  ;;  %v1518_v30 = vcombine.low %v287_v20, %v291_v23  ;;  %v1519_v32 = vcombine.high %v287_v20, %v291_v23  ;;  %v203_v34 = vmul.u32 2221713035, %v187_v21  ;;  %v204_v35 = vmul.u32 2221713035, %v188_v22  ;;  %v1298_v11 = vld [vmem:[%s2624_s6 + $0x188] sm:$0xff]  ;;  %v1299_v21 = vld [vmem:[%s2624_s6 + $0x190] sm:$0xff] }
  0x52   :  { %980 = vmatprep.subr.bf16.mxu1 %v1960_v31  ;;  %1647 = vmatprep.subr.bf16.mxu0 %v1872_v40  ;;  %v211_v36 = vshrl.u32 %v195_v27, 16  ;;  %v1783_v20 = vpack.c.bf16 %v1282_v19, %v1281_v13  ;;  %v1300_v22 = vld [vmem:[%s2624_s6 + $0x198] sm:$0xff] }
  0x53   :  { %961 = vmatprep.mubr.bf16.mxu0 %v1519_v32  ;;  %v220_v40 = vshrl.u32 %v204_v35, 16  ;;  %v1785_v23 = vpack.c.bf16 %v1300_v22, %v1299_v21  ;;  %v1301_v32 = vld [vmem:[%s2624_s6 + $0x1a0] sm:$0xff] }
  0x54   :  { %v227_v24 = vxor.u32 %v211_v36, %v195_v27  ;;  %v1283_v27 = vld [vmem:[%s2624_s6 + $0x110] sm:$0xff]  ;;  %v1286_v36 = vld [vmem:[%s2624_s6 + $0x128] sm:$0xff] }
  0x55   :  { %981 = vmatpush1.bf16.msra.mxu1 %v1871_v39  ;;  %1648 = vmatpush3.bf16.msra.mxu0 %v1873_v41  ;;  %v219_v39 = vshrl.u32 %v203_v34, 16  ;;  %v228_v41 = vxor.u32 %v212_v37, %v196_v28  ;;  %v1284_v28 = vld [vmem:[%s2624_s6 + $0x118] sm:$0xff] }
  0x56   :  { %982 = vmatprep.subr.bf16.mxu1 %v1960_v31  ;;  %1649 = vmatprep.subr.bf16.mxu0 %v1875_v29  ;;  %v236_v29 = vxor.u32 %v220_v40, %v204_v35  ;;  %v243_v44 = vshrl.u32 %v227_v24, 31  ;;  %v1285_v35 = vld [vmem:[%s2624_s6 + $0x120] sm:$0xff]  ;;  %v1288_v24 = vld [vmem:[%s2624_s6 + $0x138] sm:$0xff] }
  0x57   :  { %v235_v17 = vxor.u32 %v219_v39, %v203_v34  ;;  %v244_v45 = vshrl.u32 %v228_v41, 31  ;;  %v1791_v37 = vpack.c.bf16 %v1286_v36, %v1285_v35  ;;  %v1304_v39 = vld [vmem:[%s2624_s6 + $0x1b8] sm:$0xff]  ;;  %v1795_v41 = vpack.c.bf16 %v1288_v24, %v1287_v16  ;;  %v1044_v36 = vld [vmem:[%s2622_s4 + $0x10] sm:$0xff] }
  0x58   :  { %v252_v48 = vshrl.u32 %v236_v29, 31  ;;  %vm259_vm2 = vcmp.eq.s32.totalorder %v243_v44, 0  ;;  %v1793_v40 = vpack.c.bf16 %v1304_v39, %v1303_v38  ;;  %v1053_v16 = vld [vmem:[%s2622_s4 + $0x58] sm:$0xff] }
  0x59   :  { %983 = vmatpush1.bf16.msra.mxu1 %v1874_v54  ;;  %1650 = vmatpush3.bf16.msra.mxu0 %v1876_v58  ;;  %v251_v47 = vshrl.u32 %v235_v17, 31  ;;  %vm260_vm3 = vcmp.eq.s32.totalorder %v244_v45, 0  ;;  %v845_v54 = vsel %vm843_vm9, %v1884_v53, 0  ;;  %v1733_v58 = vpack.c.bf16 %v1047_v57, %v1043_v56  ;;  %v1306_v17 = vld [vmem:[%s2624_s6 + $0x1c8] sm:$0xff]  ;;  %v1513_v45 = vld [vmem:[%s2621_s3] ss:$0 sm:$0xff] }
  0x5a   :  { %984 = vmatprep.subr.bf16.mxu1 %v1960_v31  ;;  %vm268_vm5 = vcmp.eq.s32.totalorder %v252_v48, 0  ;;  %vm280_vm6 = vmpackc.low %vm260_vm3, %vm259_vm2  ;;  %v1013_v57 = vadd.s32 1024, %v2057_v9  ;;  %v1057_v24 = vld [vmem:[%s2622_s4 + $0x78] sm:$0xff] }
  0x5b   :  { %vm267_vm4 = vcmp.eq.s32.totalorder %v251_v47, 0  ;;  %v288_v49 = vsel %vm280_vm6, %v272_v46, 0  ;;  %1734 = vmatprep.subr.bf16.mxu0 %v1733_v58 }
  0x5c   :  { %962 = vmatmul.mubr.bf16.vlgmr.msra.gmra.mrb[4].mxu0 %v1518_v30  ;;  %vm284_vm7 = vmpackc.low %vm268_vm5, %vm267_vm4  ;;  %v1787_v30 = vpack.c.bf16 %v1284_v28, %v1283_v27  ;;  %v1014_v58 = vadd.s32 %v1013_v57, %v2070_v14 }
  0x5d   :  { %985 = vmatpush1.bf16.msra.mxu1 %v1877_v10  ;;  %v292_v7 = vsel %vm284_vm7, %v276_v43, 0  ;;  %1151 = vmatprep.mubr.f32.mxu0 %v1961_v8  ;;  %v1297_v10 = vld [vmem:[%s2624_s6 + $0x180] sm:$0xff] }
  0x5e   :  { %986 = vmatprep.subr.bf16.mxu1 %v1960_v31  ;;  %v1521_v26 = vcombine.high %v288_v49, %v292_v7  ;;  %v1520_v55 = vcombine.low %v288_v49, %v292_v7  ;;  %v1781_v12 = vpack.c.bf16 %v1298_v11, %v1297_v10 }
  0x60   :  { %1585 = vmatprep.mubr.msk.bf16.mxu1 %vm839_vm8, %v1521_v26 }
  0x61   :  { %987 = vmatpush1.bf16.msra.mxu1 %v1878_v33  ;;  %v1302_v33 = vld [vmem:[%s2624_s6 + $0x1a8] sm:$0xff] }
  0x62   :  { %988 = vmatprep.subr.bf16.mxu1 %v1960_v31  ;;  %v1789_v34 = vpack.c.bf16 %v1302_v33, %v1301_v32 }
  0x65   :  { %989 = vmatpush1.bf16.msra.mxu1 %v1879_v42  ;;  %v1305_v42 = vld [vmem:[%s2624_s6 + $0x1c0] sm:$0xff] }
  0x66   :  { %990 = vmatprep.subr.bf16.mxu1 %v1960_v31  ;;  %v1797_v29 = vpack.c.bf16 %v1306_v17, %v1305_v42 }
  0x69   :  { %991 = vmatpush1.bf16.msra.mxu1 %v1880_v15 }
  0x6a   :  { %992 = vmatprep.subr.bf16.mxu1 %v1960_v31 }
  0x6d   :  { %993 = vmatpush1.bf16.msra.mxu1 %v1881_v50 }
  0x6e   :  { %994 = vmatprep.subr.bf16.mxu1 %v1960_v31 }
  0x71   :  { %995 = vmatpush1.bf16.msra.mxu1 %v1882_v51 }
  0x72   :  { %996 = vmatprep.subr.bf16.mxu1 %v1960_v31 }
  0x75   :  { %997 = vmatpush1.bf16.msra.mxu1 %v1883_v52 }
  0x76   :  { %998 = vmatprep.subr.bf16.mxu1 %v1960_v31  ;;  %v1046_v31 = vld [vmem:[%s2622_s4 + $0x20] sm:$0xff] }
  0x77   :  { %v1735_v60 = vpack.c.bf16 %v1046_v31, %v1042_v59  ;;  %v1016_v59 = vxor.u32 %v1014_v58, %v2098_v25  ;;  %v1015_v31 = vadd.s32 %v1013_v57, %v2079_v18  ;;  %v1252_v57 = vld [vmem:[%s2624_s6 + $0x18] sm:$0xff]  ;;  %v1269_v58 = vld [vmem:[%s2624_s6 + $0xa0] sm:$0xff] }
  0x79   :  { %999 = vmatpush1.bf16.msra.mxu1 %v845_v54  ;;  %1736 = vmatpush1.bf16.msra.mxu0 %v1735_v60  ;;  %v1018_v60 = vshrl.u32 %v1016_v59, 16  ;;  %v1017_v61 = vxor.u32 %v1015_v31, %v2098_v25 }
  0x7a   :  { %1738 = vmatprep.subr.bf16.mxu0 %v1737_v63  ;;  %1782 = vmatprep.subr.bf16.mxu1 %v1781_v12 }
  0x7b   :  { %v1020_v63 = vxor.u32 %v1018_v60, %v1016_v59  ;;  %v1019_v0 = vshrl.u32 %v1017_v61, 16  ;;  %v1270_v59 = vld [vmem:[%s2624_s6 + $0xa8] sm:$0xff] }
  0x7c   :  { %1003 = vmatmul.mubr.bf16.vlgmr.msra.gmra.mrb[4].mxu1 %v1520_v55  ;;  %v1757_v60 = vpack.c.bf16 %v1270_v59, %v1269_v58 }
  0x7d   :  { %1740 = vmatpush1.bf16.msra.mxu0 %v1739_v2  ;;  %1784 = vmatpush3.bf16.msra.mxu1 %v1783_v20  ;;  %v1022_v11 = vmul.u32 2146121005, %v1020_v63  ;;  %v1021_v9 = vxor.u32 %v1019_v0, %v1017_v61  ;;  %v1253_v61 = vld [vmem:[%s2624_s6 + $0x20] sm:$0xff]  ;;  %v1271_v63 = vld [vmem:[%s2624_s6 + $0xb0] sm:$0xff] }
  0x7e   :  { %1742 = vmatprep.subr.bf16.mxu0 %v1741_v6  ;;  %1786 = vmatprep.subr.bf16.mxu1 %v1785_v23 }
  0x7f   :  { %v1024_v14 = vshrl.u32 %v1022_v11, 15  ;;  %v1023_v13 = vmul.u32 2146121005, %v1021_v9  ;;  %v1257_v9 = vld [vmem:[%s2624_s6 + $0x40] sm:$0xff] }
  0x81   :  { %1788 = vmatpush3.bf16.msra.mxu1 %v1787_v30  ;;  %v1026_v19 = vxor.u32 %v1024_v14, %v1022_v11  ;;  %v1025_v20 = vshrl.u32 %v1023_v13, 15  ;;  %v1275_v14 = vld [vmem:[%s2624_s6 + $0xd0] sm:$0xff] }
  0x82   :  { %1790 = vmatprep.subr.bf16.mxu1 %v1789_v34 }
  0x83   :  { %v1028_v18 = vmul.u32 2221713035, %v1026_v19  ;;  %v1027_v21 = vxor.u32 %v1025_v20, %v1023_v13  ;;  %v1276_v13 = vld [vmem:[%s2624_s6 + $0xd8] sm:$0xff] }
  0x84   :  { %v1769_v20 = vpack.c.bf16 %v1276_v13, %v1275_v14 }
  0x85   :  { %1792 = vmatpush3.bf16.msra.mxu1 %v1791_v37  ;;  %v1030_v22 = vshrl.u32 %v1028_v18, 16  ;;  %v1029_v25 = vmul.u32 2221713035, %v1027_v21  ;;  %v1048_v37 = vld [vmem:[%s2622_s4 + $0x30] sm:$0xff]  ;;  %v1260_v21 = vld [vmem:[%s2624_s6 + $0x58] sm:$0xff] }
  0x86   :  { %1794 = vmatprep.subr.bf16.mxu1 %v1793_v40 }
  0x87   :  { %v1032_v23 = vxor.u32 %v1030_v22, %v1028_v18  ;;  %v1031_v27 = vshrl.u32 %v1029_v25, 16  ;;  %v1259_v18 = vld [vmem:[%s2624_s6 + $0x50] sm:$0xff]  ;;  %v1277_v22 = vld [vmem:[%s2624_s6 + $0xe0] sm:$0xff] }
  0x89   :  { %1796 = vmatpush3.bf16.msra.mxu1 %v1795_v41  ;;  %v1034_v30 = vshrl.u32 %v1032_v23, 31  ;;  %v1033_v32 = vxor.u32 %v1031_v27, %v1029_v25  ;;  %v1278_v25 = vld [vmem:[%s2624_s6 + $0xe8] sm:$0xff]  ;;  %v1771_v23 = vpack.c.bf16 %v1260_v21, %v1259_v18 }
  0x8a   :  { %1798 = vmatprep.subr.bf16.mxu1 %v1797_v29  ;;  %v1743_v29 = vpack.c.bf16 %v1048_v37, %v1044_v36  ;;  %v1773_v27 = vpack.c.bf16 %v1278_v25, %v1277_v22  ;;  %v1279_v36 = vld [vmem:[%s2624_s6 + $0xf0] sm:$0xff]  ;;  %v1280_v37 = vld [vmem:[%s2624_s6 + $0xf8] sm:$0xff] }
  0x8b   :  { %vm1036_vm10 = vcmp.eq.s32.totalorder %v1034_v30, 0  ;;  %v1035_v41 = vshrl.u32 %v1033_v32, 31  ;;  %v1262_v30 = vld [vmem:[%s2624_s6 + $0x68] sm:$0xff]  ;;  %v1289_v32 = vld [vmem:[%s2624_s6 + $0x140] sm:$0xff] }
  0x8d   :  { %vm1037_vm12 = vcmp.eq.s32.totalorder %v1035_v41, 0 }
 0x10f   :  { %v1607_v44 = vpop.f32.mrb[0].mxu0 }
 0x110   :  { %v1608_v46 = vpop.f32.mrb[1].mxu0 }
 0x111   :  { %v1609_v47 = vadd.f32 %v1608_v46, %v1607_v44  ;;  %v1610_v48 = vpop.f32.mrb[2].mxu0  ;;  %v1745_v44 = vpack.c.bf16 %v1057_v24, %v1053_v16  ;;  %v1056_v46 = vld [vmem:[%s2622_s4 + $0x70] sm:$0xff]  ;;  %v1264_v24 = vld [vmem:[%s2624_s6 + $0x78] sm:$0xff] }
 0x112   :  { %v1611_v15 = vpop.f32.mrb[3].mxu0  ;;  %v1263_v16 = vld [vmem:[%s2624_s6 + $0x70] sm:$0xff] }
 0x113   :  { %v1629_v43 = vpop.f32.mrb[0].mxu1  ;;  %v882_v49 = vadd.f32 %v1609_v47, %v1513_v45  ;;  %v1612_v26 = vadd.f32 %v1611_v15, %v1610_v48  ;;  %v1266_v15 = vld [vmem:[%s2624_s6 + $0x88] sm:$0xff] }
 0x114   :  { %v1630_v7 = vpop.f32.mrb[1].mxu1 }
 0x115   :  { %v1631_v50 = vadd.f32 %v1630_v7, %v1629_v43  ;;  %v1632_v51 = vpop.f32.mrb[2].mxu1  ;;  %v885_v52 = vadd.f32 %v1612_v26, %v1513_v45  ;;  %v1052_v45 = vld [vmem:[%s2622_s4 + $0x50] sm:$0xff]  ;;  %v1265_v43 = vld [vmem:[%s2624_s6 + $0x80] sm:$0xff] }
 0x116   :  { %v1633_v53 = vpop.f32.mrb[3].mxu1  ;;  %v1749_v7 = vpack.c.bf16 %v1266_v15, %v1265_v43  ;;  %v1249_v26 = vld [vmem:[%s2624_s6] sm:$0xff]  ;;  %v1294_v43 = vld [vmem:[%s2624_s6 + $0x168] sm:$0xff] }
 0x117   :  { %v923_v54 = vadd.f32 %v1631_v50, %v882_v49  ;;  %v1634_v55 = vadd.f32 %v1633_v53, %v1632_v51  ;;  %v1747_v49 = vpack.c.bf16 %v1056_v46, %v1052_v45  ;;  %v1250_v50 = vld [vmem:[%s2624_s6 + $0x8] sm:$0xff]  ;;  %v1268_v53 = vld [vmem:[%s2624_s6 + $0x98] sm:$0xff]  ;;  %v1309_v45 = vld [vmem:[%s2624_s6 + $0x1e0] sm:$0xff] }
 0x118   :  { %v1310_v46 = vld [vmem:[%s2624_s6 + $0x1e8] sm:$0xff] }
 0x119   :  { %v926_v56 = vadd.f32 %v1634_v55, %v885_v52  ;;  %v1267_v52 = vld [vmem:[%s2624_s6 + $0x90] sm:$0xff] }
 0x11a   :  { %v1753_v55 = vpack.c.bf16 %v1268_v53, %v1267_v52  ;;  %v1062_v53 = vsub.s32 0, %v2046_v5 }
 0x12f   :  { %v1651_v62 = vpop.f32.mrb[4].mxu0 }
 0x130   :  { %v1652_v1 = vpop.f32.mrb[5].mxu0 }
 0x131   :  { %v1653_v2 = vadd.f32 %v1652_v1, %v1651_v62  ;;  %v1654_v3 = vpop.f32.mrb[6].mxu0  ;;  %v1254_v62 = vld [vmem:[%s2624_s6 + $0x28] sm:$0xff] }
 0x132   :  { %v1655_v4 = vpop.f32.mrb[7].mxu0  ;;  %v1759_v0 = vpack.c.bf16 %v1254_v62, %v1253_v61  ;;  %v1074_v62 = vsub.s32 3, %v2046_v5 }
 0x133   :  { %v1656_v6 = vadd.f32 %v1655_v4, %v1654_v3  ;;  %v964_v10 = vadd.f32 %v1653_v2, %v923_v54  ;;  %v1751_v54 = vpack.c.bf16 %v1250_v50, %v1249_v26  ;;  %v1255_v2 = vld [vmem:[%s2624_s6 + $0x30] sm:$0xff]  ;;  %v1256_v3 = vld [vmem:[%s2624_s6 + $0x38] sm:$0xff]  ;;  %v1273_v4 = vld [vmem:[%s2624_s6 + $0xc0] sm:$0xff] }
 0x134   :  { %v1295_v50 = vld [vmem:[%s2624_s6 + $0x170] sm:$0xff] }
 0x135   :  { %v967_v12 = vadd.f32 %v1656_v6, %v926_v56  ;;  %v1251_v56 = vld [vmem:[%s2624_s6 + $0x10] sm:$0xff]  ;;  %v1274_v6 = vld [vmem:[%s2624_s6 + $0xc8] sm:$0xff] }
 0x136   :  { %v1755_v31 = vpack.c.bf16 %v1252_v57, %v1251_v56  ;;  %v1765_v11 = vpack.c.bf16 %v1274_v6, %v1273_v4 }
 0x14f   :  { %v1004_v28 = vpop.f32.mrb[4].mxu1 }
 0x150   :  { %v1005_v33 = vadd.f32 %v1004_v28, %v964_v10  ;;  %v1006_v34 = vpop.f32.mrb[5].mxu1  ;;  %v1763_v10 = vpack.c.bf16 %v1256_v3, %v1255_v2  ;;  %v1261_v28 = vld [vmem:[%s2624_s6 + $0x60] sm:$0xff] }
 0x151   :  { %v1007_v35 = vpop.f32.mrb[6].mxu1  ;;  %v1290_v34 = vld [vmem:[%s2624_s6 + $0x148] sm:$0xff] }
 0x152   :  { %v1011_v38 = vmax.f32 %v1005_v33, 0.0  ;;  %v1008_v39 = vadd.f32 %v1007_v35, %v967_v12  ;;  %v1009_v40 = vpop.f32.mrb[7].mxu1  ;;  %v1258_v12 = vld [vmem:[%s2624_s6 + $0x48] sm:$0xff]  ;;  %v1775_v33 = vpack.c.bf16 %v1262_v30, %v1261_v28  ;;  %v1799_v35 = vpack.c.bf16 %v1290_v34, %v1289_v32 }
 0x153   :  { %v1767_v19 = vpack.c.bf16 %v1258_v12, %v1257_v9  ;;  %v1308_v40 = vld [vmem:[%s2624_s6 + $0x1d8] sm:$0xff] }
 0x154   :  { %v1038_v42 = vmul.f32 2.0, %v1011_v38  ;;  %v1012_v17 = vmax.f32 %v1008_v39, 0.0  ;;  %v1307_v38 = vld [vmem:[%s2624_s6 + $0x1d0] sm:$0xff]  ;;  %1800 = vmatpush3.bf16.msra.mxu1 %v1799_v35  ;;  %v1777_v39 = vpack.c.bf16 %v1280_v37, %v1279_v36 }
 0x155   :  { %v1801_v41 = vpack.c.bf16 %v1308_v40, %v1307_v38 }
 0x156   :  { %v1040_v47 = vsel %vm1036_vm10, %v1038_v42, 0.0  ;;  %v1039_v48 = vmul.f32 2.0, %v1012_v17  ;;  %v1779_v42 = vpack.c.bf16 %v1264_v24, %v1263_v16  ;;  %v1291_v17 = vld [vmem:[%s2624_s6 + $0x150] sm:$0xff] }
 0x157   :  { %1586 = vmatmul.mubr.msk.f32.vlgmr.msra.gmra.mrb[8].mxu0 %vm1080_vm11, %v1040_v47  ;;  %1802 = vmatprep.subr.bf16.mxu1 %v1801_v41 }
 0x158   :  { %1744 = vmatpush1.bf16.msra.mxu0 %v1743_v29  ;;  %1157 = vmatprep.mubr.f32.mxu0 %v1961_v8  ;;  %v1041_v51 = vsel %vm1037_vm12, %v1039_v48, 0.0  ;;  %v1292_v29 = vld [vmem:[%s2624_s6 + $0x158] sm:$0xff]  ;;  %v1293_v48 = vld [vmem:[%s2624_s6 + $0x160] sm:$0xff] }
 0x159   :  { %1746 = vmatprep.subr.bf16.mxu0 %v1745_v44  ;;  %v1803_v44 = vpack.c.bf16 %v1292_v29, %v1291_v17  ;;  %v1807_v15 = vpack.c.bf16 %v1294_v43, %v1293_v48 }
 0x15b   :  { %1587 = vmatmul.mubr.msk.f32.gmra.mrb[10].mxu0 %vm1080_vm11, %v1041_v51  ;;  %1804 = vmatpush3.bf16.msra.mxu1 %v1803_v44 }
 0x15c   :  { %1748 = vmatpush1.bf16.msra.mxu0 %v1747_v49  ;;  %1228 = vmatprep.mubr.f32.mxu0 %v1961_v8  ;;  %v1311_v49 = vld [vmem:[%s2624_s6 + $0x1f0] sm:$0xff] }
 0x15d   :  { %1750 = vmatprep.subr.bf16.mxu0 %v1749_v7  ;;  %v1312_v7 = vld [vmem:[%s2624_s6 + $0x1f8] sm:$0xff] }
 0x15e   :  { %v1809_v26 = vpack.c.bf16 %v1312_v7, %v1311_v49 }
 0x15f   :  { %1588 = vmatmul.mubr.msk.f32.vlgmr.msra.gmra.mrb[12].mxu0 %vm1080_vm11, %v1040_v47  ;;  %v1805_v47 = vpack.c.bf16 %v1310_v46, %v1309_v45 }
 0x160   :  { %1234 = vmatprep.mubr.f32.mxu0 %v1961_v8  ;;  %1752 = vmatpush3.bf16.msra.mxu0 %v1751_v54  ;;  %v1272_v8 = vld [vmem:[%s2624_s6 + $0xb8] sm:$0xff]  ;;  %v1058_v54 = vld [vmem:[%s2623_s5] sm:$0xf]  ;;  %s1962_s5 = smov [#allocation8]  }
 0x161   :  { %1754 = vmatprep.subr.bf16.mxu0 %v1753_v55  ;;  %v1761_v1 = vpack.c.bf16 %v1272_v8, %v1271_v63  ;;  %1806 = vmatprep.subr.bf16.mxu1 %v1805_v47  ;;  %v1066_v55 = vsub.s32 1, %v2046_v5  ;;  %v1063_v56 = vrot.slane %v1058_v54, %v1062_v53  ;;  %v1075_v6 = vrot.slane %v1058_v54, %v1074_v62 }
 0x162   :  { %1808 = vmatpush3.bf16.msra.mxu1 %v1807_v15 }
 0x163   :  { %1589 = vmatmul.mubr.msk.f32.gmra.mrb[14].mxu0 %vm1080_vm11, %v1041_v51  ;;  %v1296_v51 = vld [vmem:[%s2624_s6 + $0x178] sm:$0xff]  ;;  %1810 = vmatprep.subr.bf16.mxu1 %v1809_v26  ;;  %v1067_v57 = vrot.slane %v1058_v54, %v1066_v55  ;;  %s1497_s6 = sshll.u32 %s1962_s5, 4  ;;  %s1498_s6 = int_to_ptr.vmem [resolvable:$true] %s1497_s6 }
 0x164   :  { %1756 = vmatpush3.bf16.msra.mxu0 %v1755_v31  ;;  %v1811_v52 = vpack.c.bf16 %v1296_v51, %v1295_v50  ;;  %s1907_s11 = scalar_lea.vmem %s1498_s6, 1024  ;;  %p1912_p9 = scmp.lt.s32.totalorder %s1498_s6, %s1498_s6 }
 0x165   :  { %1758 = vmatprep.subr.bf16.mxu0 %v1757_v60  ;;  %v1070_v60 = vsub.s32 2, %v2046_v5  ;;  %p1908_p8 = scmp.ne.s32.totalorder %s1498_s6, %s1907_s11  ;;  %p1913_p10 = scmp.lt.s32.totalorder %s1907_s11, %s1907_s11 }
 0x166   :  { %1812 = vmatpush3.bf16.msra.mxu1 %v1811_v52 }
 0x167   :  { %v1071_v3 = vrot.slane %v1058_v54, %v1070_v60  ;;  %p1914_p11 = por %p1913_p10, %p1912_p9 }
 0x168   :  { %1760 = vmatpush3.bf16.msra.mxu0 %v1759_v0 }
 0x169   :  { %1762 = vmatprep.subr.bf16.mxu0 %v1761_v1  ;;  %p1915_p12 = pnand %p1914_p11, %p1908_p8 }
 0x16c   :  { %1764 = vmatpush3.bf16.msra.mxu0 %v1763_v10 }
 0x16d   :  { %1766 = vmatprep.subr.bf16.mxu0 %v1765_v11 }
 0x170   :  { %1768 = vmatpush3.bf16.msra.mxu0 %v1767_v19 }
 0x171   :  { %1770 = vmatprep.subr.bf16.mxu0 %v1769_v20 }
 0x174   :  { %1772 = vmatpush3.bf16.msra.mxu0 %v1771_v23 }
 0x175   :  { %1774 = vmatprep.subr.bf16.mxu0 %v1773_v27 }
 0x178   :  { %1776 = vmatpush3.bf16.msra.mxu0 %v1775_v33 }
 0x179   :  { %1778 = vmatprep.subr.bf16.mxu0 %v1777_v39 }
 0x17c   :  { %1780 = vmatpush3.bf16.msra.mxu0 %v1779_v42 }
 0x22a   :  { %v1153_v58 = vpop.f32.mrb[8].mxu0 }
 0x22b   :  { %v1154_v59 = vadd.f32 %v1153_v58, %v1063_v56  ;;  %v1155_v31 = vpop.f32.mrb[9].mxu0 }
 0x22c   :  { %v1156_v61 = vadd.f32 %v1155_v31, %v1067_v57 }
 0x22d   :  { %v1241_v63 = vmax.f32 %v1154_v59, 0.0 }
 0x22e   :  { %v1242_v8 = vmax.f32 %v1156_v61, 0.0  ;;  %v1159_v0 = vpop.f32.mrb[10].mxu0 }
 0x22f   :  { %1470 = vst [vmem:[#allocation8] sm:$0xff] %v1241_v63  ;;  %v1160_v1 = vadd.f32 %v1159_v0, %v1063_v56  ;;  %v1161_v2 = vpop.f32.mrb[11].mxu0 }
 0x230   :  { %1471 = vst [vmem:[#allocation8 + $0x8] sm:$0xff] %v1242_v8  ;;  %v1162_v4 = vadd.f32 %v1161_v2, %v1067_v57  ;;  %1384 = vmatprep.mubr.f32.mxu0 %v1242_v8 }
 0x231   :  { %v1245_v10 = vmax.f32 %v1160_v1, 0.0  ;;  %1385 = vmatmul.mubr.f32.vlgmr.msra.gmra.mrb[16].mxu0 %v1241_v63 }
 0x232   :  { %v1246_v11 = vmax.f32 %v1162_v4, 0.0  ;;  %v1230_v9 = vpop.f32.mrb[12].mxu0 }
 0x233   :  { %1474 = vst [vmem:[#allocation8 + $0x20] sm:$0xff] %v1245_v10  ;;  %v1231_v12 = vadd.f32 %v1230_v9, %v1071_v3  ;;  %v1232_v14 = vpop.f32.mrb[13].mxu0 }
 0x234   :  { %1475 = vst [vmem:[#allocation8 + $0x28] sm:$0xff] %v1246_v11  ;;  %v1233_v5 = vadd.f32 %v1232_v14, %v1075_v6  ;;  %1389 = vmatprep.mubr.f32.mxu0 %v1246_v11 }
 0x235   :  { %v1243_v13 = vmax.f32 %v1231_v12, 0.0  ;;  %1390 = vmatmul.mubr.f32.gmra.mrb[18].mxu0 %v1245_v10 }
 0x236   :  { %v1244_v19 = vmax.f32 %v1233_v5, 0.0  ;;  %v1236_v20 = vpop.f32.mrb[14].mxu0 }
 0x237   :  { %1472 = vst [vmem:[#allocation8 + $0x10] sm:$0xff] %v1243_v13  ;;  %v1237_v18 = vadd.f32 %v1236_v20, %v1071_v3  ;;  %v1238_v21 = vpop.f32.mrb[15].mxu0 }
 0x238   :  { %1473 = vst [vmem:[#allocation8 + $0x18] sm:$0xff] %v1244_v19  ;;  %v1239_v22 = vadd.f32 %v1238_v21, %v1075_v6  ;;  %1459 = vmatprep.mubr.f32.mxu1 %v1244_v19 }
 0x239   :  { %v1247_v25 = vmax.f32 %v1237_v18, 0.0  ;;  %1460 = vmatmul.mubr.f32.vlgmr.msra.gmra.mrb[8].mxu1 %v1243_v13 }
 0x23a   :  { %v1248_v23 = vmax.f32 %v1239_v22, 0.0 }
 0x23b   :  { %1476 = vst [vmem:[#allocation8 + $0x30] sm:$0xff] %v1247_v25 }
 0x23c   :  { %1477 = vst [vmem:[#allocation8 + $0x38] sm:$0xff] %v1248_v23  ;;  %1464 = vmatprep.mubr.f32.mxu1 %v1248_v23 }
 0x23d   :  { %1465 = vmatmul.mubr.f32.gmra.mrb[10].mxu1 %v1247_v25 }
 0x23e   :  { %1918 = shalt.err (!%p1915_p12)
}
 0x23f   :  { %s1919_s12 = scalar_lea.hbm %s2627_s9, 1024 }
 0x240   :  { %p1920_p13 = scmp.ne.s32.totalorder %s2627_s9, %s1919_s12  ;;  %p1923_p0 = scmp.lt.u32.totalorder %s1919_s12, %s2627_s9 }
 0x242   :  { %p1925_p1 = pnand %p1923_p0, %p1920_p13 }
 0x244   :  { %1928 = shalt.err (!%p1925_p1)
}
 0x245   :  { %1503 = dma.vmem_to_hbm [thread:$0]  %s1498_s6, 1024, %s2627_s9, [#allocation9], %s1958_s19, %s1958_s19, %s1959_s20  }
 0x246   :  { %v1590_v35 = vld [vmem:[%s2625_s7] ss:$0 sm:$0xff]  ;;  %s1963_s21 = smov [#allocation7]  }
 0x247   :  { %s1485_s22 = sshll.u32 %s1963_s21, 4  ;;  %s1486_s22 = int_to_ptr.vmem [resolvable:$true] %s1485_s22 }
 0x248   :  { %s1929_s9 = scalar_lea.vmem %s1486_s22, 256  ;;  %p1934_p3 = scmp.lt.s32.totalorder %s1486_s22, %s1486_s22 }
 0x249   :  { %p1930_p2 = scmp.ne.s32.totalorder %s1486_s22, %s1929_s9  ;;  %p1935_p4 = scmp.lt.s32.totalorder %s1929_s9, %s1929_s9 }
 0x24b   :  { %p1936_p5 = por %p1935_p4, %p1934_p3 }
 0x24d   :  { %p1937_p6 = pnand %p1936_p5, %p1930_p2 }
 0x304   :  { %v1689_v27 = vpop.f32.mrb[16].mxu0 }
 0x305   :  { %v1690_v28 = vpop.f32.mrb[17].mxu0 }
 0x306   :  { %v1691_v30 = vadd.f32 %v1690_v28, %v1689_v27 }
 0x308   :  { %v1692_v32 = vpop.f32.mrb[18].mxu0  ;;  %v1387_v38 = vadd.f32 %v1691_v30, %v1590_v35 }
 0x309   :  { %v1693_v33 = vpop.f32.mrb[19].mxu0 }
 0x30a   :  { %v1694_v34 = vadd.f32 %v1693_v33, %v1692_v32 }
 0x30c   :  { %v1727_v36 = vpop.f32.mrb[8].mxu1  ;;  %v1392_v41 = vadd.f32 %v1694_v34, %v1590_v35 }
 0x30d   :  { %v1728_v37 = vpop.f32.mrb[9].mxu1 }
 0x30e   :  { %v1729_v39 = vadd.f32 %v1728_v37, %v1727_v36 }
 0x310   :  { %v1462_v40 = vadd.f32 %v1729_v39, %v1387_v38  ;;  %v1730_v16 = vpop.f32.mrb[10].mxu1 }
 0x311   :  { %v1731_v24 = vpop.f32.mrb[11].mxu1 }
 0x312   :  { %1478 = vst [vmem:[#allocation7] sm:$0xff] %v1462_v40  ;;  %v1732_v42 = vadd.f32 %v1731_v24, %v1730_v16 }
 0x314   :  { %v1467_v17 = vadd.f32 %v1732_v42, %v1392_v41 }
 0x316   :  { %1479 = vst [vmem:[#allocation7 + $0x8] sm:$0xff] %v1467_v17 }
 0x317   :  { %1940 = shalt.err (!%p1937_p6)
}
 0x318   :  { %s1941_s20 = scalar_lea.hbm %s2626_s8, 256 }
 0x319   :  { %p1942_p7 = scmp.ne.s32.totalorder %s2626_s8, %s1941_s20  ;;  %p1945_p8 = scmp.lt.u32.totalorder %s1941_s20, %s2626_s8 }
 0x31b   :  { %p1947_p9 = pnand %p1945_p8, %p1942_p7 }
 0x31d   :  { %1950 = shalt.err (!%p1947_p9)
}
 0x31e   :  { %s1964_s24 = smov 128   ;;  %s1965_s26 = smov 8  }
 0x31f   :  { %1491 = dma.vmem_to_hbm [thread:$0]  %s1486_s22, 256, %s2626_s8, [#allocation6], %s1964_s24, %s1964_s24, %s1965_s26  }
 0x320   :  { %1953 = dma.done.wait [#allocation6], 256  }
 0x321   :  { %1954 = vsyncadd [#allocation6], 4294967040 }
 0x322   :  { %1955 = dma.done.wait [#allocation9], 1024  }
 0x323   :  { %1956 = vsyncadd [#allocation9], 4294966272 }
 0x324   :  { %1510 = vsyncpa [#allocation5], 1 }
 0x325   :  { %1511 = vsyncpa [#allocation6], 1 }
 0x326   :  { %1512 = vsyncpa [#allocation9], 1 }

</bundles_post_ra>
